<compile_context>
chip_gen: v7x
topology: tpu7x:2x2x1
jax: 0.10.0
libtpu: 0.0.40
codegen_flags: <defaults>
</compile_context>

<pallas_src>
import jax
import jax.numpy as jnp
from jax.experimental import pallas as pl
from jax.experimental.pallas import tpu as pltpu

LANE = 128          # lane width: padding target for matmul N dims / output store
SUBLANE = 8         # f32 sublane tile
DEFAULT_TILE_B = 512


def _round_up(n, m):
    return ((n + m - 1) // m) * m


def mlp_kernel(x_ref, w1_ref, b1_ref, w2_ref, b2_ref, w3_ref, b3_ref, o_ref):
    mxu_dtype = w1_ref.dtype
    x = x_ref[...].astype(mxu_dtype)
    # fc1 + ReLU  (MXU matmul with f32 accumulation; bias add / ReLU in f32 on VPU)
    h = jnp.dot(x, w1_ref[...], preferred_element_type=jnp.float32) + b1_ref[...]
    h = jnp.maximum(h, 0.0).astype(mxu_dtype)
    # fc2 + ReLU
    h = jnp.dot(h, w2_ref[...], preferred_element_type=jnp.float32) + b2_ref[...]
    h = jnp.maximum(h, 0.0).astype(mxu_dtype)
    # fc3 (no activation)
    out = jnp.dot(h, w3_ref[...], preferred_element_type=jnp.float32) + b3_ref[...]
    o_ref[...] = out.astype(o_ref.dtype)


def prepare_params(params, matmul_dtype=jnp.float32):
    """One-time conversion of PyTorch-convention params into kernel layout.

    (out, in) weights -> (K_pad, N_pad) with K_pad = previous layer's padded
    width (input_dim stays unpadded) and N_pad = round_up(out, 128).
    (out,) biases -> (1, N_pad), float32.  Zero padding guarantees padded lanes
    contribute exactly 0 to every dot / ReLU, so results are bit-identical to
    the unpadded computation (in f32).
    """
    in_dim = int(params["w1"].shape[1])
    hidden = int(params["w1"].shape[0])
    out_dim = int(params["w3"].shape[0])
    n1 = _round_up(hidden, LANE)
    n2 = _round_up(hidden, LANE)
    n3 = _round_up(out_dim, LANE)

    def prep_w(w, k_pad, n_pad):
        out_f, in_f = w.shape
        wp = jnp.zeros((k_pad, n_pad), jnp.float32)
        wp = wp.at[:in_f, :out_f].set(w.T.astype(jnp.float32))
        return wp.astype(matmul_dtype)

    def prep_b(b, n_pad):
        bp = jnp.zeros((1, n_pad), jnp.float32)
        return bp.at[0, : b.shape[0]].set(b.astype(jnp.float32))

    return {
        "w1": prep_w(params["w1"], in_dim, n1), "b1": prep_b(params["b1"], n1),
        "w2": prep_w(params["w2"], n1, n2),     "b2": prep_b(params["b2"], n2),
        "w3": prep_w(params["w3"], n2, n3),     "b3": prep_b(params["b3"], n3),
        "in_dim": in_dim,
        "out_dim": out_dim,
    }


def mlp_forward(x, kp, tile_b=DEFAULT_TILE_B):
    """x: (B, input_dim) float array. kp: output of prepare_params()."""
    B, in_dim = x.shape
    assert in_dim == kp["in_dim"], "input feature dim mismatch"
    n1 = kp["w1"].shape[1]
    n2 = kp["w2"].shape[1]
    n3 = kp["w3"].shape[1]
    out_dim = kp["out_dim"]

    # Batch tiling: multiple of 8 sublanes, up to tile_b rows per grid step.
    tile_b = min(tile_b, _round_up(B, SUBLANE))
    tile_b = _round_up(tile_b, SUBLANE)
    b_pad = _round_up(B, tile_b)
    grid = (b_pad // tile_b,)

    xp = x.astype(jnp.float32)
    if b_pad != B:
        xp = jnp.pad(xp, ((0, b_pad - B), (0, 0)))

    # Advisory cost estimate for the XLA scheduler.
    w_isz = jnp.dtype(kp["w1"].dtype).itemsize
    w_elems = in_dim * n1 + n1 * n2 + n2 * n3
    flops = 2 * b_pad * w_elems
    bytes_accessed = (
        b_pad * in_dim * 4 + b_pad * n3 * 4      # x in, out
        + w_elems * w_isz                        # weights
        + (n1 + n2 + n3) * 4                     # biases
    )
    cost = pl.CostEstimate(flops=flops, transcendentals=0,
                           bytes_accessed=bytes_accessed)

    # VMEM budget: double-buffered x/out tiles + resident weights/biases +
    # live f32 intermediates, 2x headroom, clamped to <= 64 MiB (v7x physical).
    vmem_est = (
        2 * tile_b * (in_dim + n3) * 4
        + 2 * w_elems * w_isz
        + 2 * (n1 + n2 + n3) * 4
        + 4 * tile_b * max(n1, n2) * 4
    )
    vmem_limit = int(min(max(32 << 20, 2 * vmem_est), 64 << 20))

    row_map = lambda i: (i, 0)
    const_map = lambda i: (0, 0)

    out_padded = pl.pallas_call(
        mlp_kernel,
        out_shape=jax.ShapeDtypeStruct((b_pad, n3), jnp.float32),
        grid=grid,
        in_specs=[
            pl.BlockSpec((tile_b, in_dim), row_map),  # x tile (pipelined)
            pl.BlockSpec((in_dim, n1), const_map),    # w1 (VMEM resident)
            pl.BlockSpec((1, n1), const_map),         # b1
            pl.BlockSpec((n1, n2), const_map),        # w2
            pl.BlockSpec((1, n2), const_map),         # b2
            pl.BlockSpec((n2, n3), const_map),        # w3
            pl.BlockSpec((1, n3), const_map),         # b3
        ],
        out_specs=pl.BlockSpec((tile_b, n3), row_map),
        compiler_params=pltpu.CompilerParams(
            dimension_semantics=("parallel",),
            vmem_limit_bytes=vmem_limit,
        ),
        cost_estimate=cost,
    )(xp, kp["w1"], kp["b1"], kp["w2"], kp["b2"], kp["w3"], kp["b3"])

    return out_padded[:B, :out_dim]


def init_params(key, input_dim, hidden, output_dim):
    """Deterministic init mimicking nn.Linear default (uniform +-1/sqrt(fan_in))."""
    ks = jax.random.split(key, 6)

    def lin(kw, kb, fan_in, fan_out):
        bound = 1.0 / jnp.sqrt(fan_in)
        w = jax.random.uniform(kw, (fan_out, fan_in), jnp.float32, -bound, bound)
        b = jax.random.uniform(kb, (fan_out,), jnp.float32, -bound, bound)
        return w, b

    w1, b1 = lin(ks[0], ks[1], input_dim, hidden)
    w2, b2 = lin(ks[2], ks[3], hidden, hidden)
    w3, b3 = lin(ks[4], ks[5], hidden, output_dim)
    return {"w1": w1, "b1": b1, "w2": w2, "b2": b2, "w3": w3, "b3": b3}


def mlp_reference(x, p):
    h = jnp.maximum(x @ p["w1"].T + p["b1"], 0.0)
    h = jnp.maximum(h @ p["w2"].T + p["b2"], 0.0)
    return h @ p["w3"].T + p["b3"]


if __name__ == "__main__":
    key = jax.random.PRNGKey(0)
    k_x, k_p = jax.random.split(key)

    batch, input_dim, hidden, output_dim = 256, 32, 64, 16
    x = jax.random.normal(k_x, (batch, input_dim), jnp.float32)
    params = init_params(k_p, input_dim, hidden, output_dim)
    ref = mlp_reference(x, params)

    # f32 MXU operands (v5e-friendly path); single grid step at default tile.
    kp_f32 = prepare_params(params, matmul_dtype=jnp.float32)
    out = jax.block_until_ready(mlp_forward(x, kp_f32))
    assert out.shape == (batch, output_dim)
    assert jnp.allclose(out, ref, atol=1e-4, rtol=1e-4), "f32 mismatch vs reference"

    # bf16 MXU operands (v6e/v7x fast path), multi-step grid (4 tiles of 64 rows).
    kp_bf16 = prepare_params(params, matmul_dtype=jnp.bfloat16)
    out_bf16 = jax.block_until_ready(mlp_forward(x, kp_bf16, tile_b=64))
    assert out_bf16.shape == (batch, output_dim)
    assert jnp.allclose(out_bf16, ref, atol=5e-2, rtol=5e-2), "bf16 mismatch vs reference"

    # Ragged batch (exercises the batch-padding path: B=100, tile=64 -> pad to 128).
    out_ragged = jax.block_until_ready(mlp_forward(x[:100], kp_f32, tile_b=64))
    assert out_ragged.shape == (100, output_dim)
    assert jnp.allclose(out_ragged, ref[:100], atol=1e-4, rtol=1e-4), "ragged mismatch"

    print("KERNEL_OK")
</pallas_src>

<mosaic_0001>
module attributes {stable_mosaic.version = 11 : i64} {
  func.func @mlp_kernel(%arg0: i32, %arg1: memref<256x32xf32, #tpu.memory_space<vmem>>, %arg2: memref<32x128xf32, #tpu.memory_space<vmem>>, %arg3: memref<1x128xf32, #tpu.memory_space<vmem>>, %arg4: memref<128x128xf32, #tpu.memory_space<vmem>>, %arg5: memref<1x128xf32, #tpu.memory_space<vmem>>, %arg6: memref<128x128xf32, #tpu.memory_space<vmem>>, %arg7: memref<1x128xf32, #tpu.memory_space<vmem>>, %arg8: memref<256x128xf32, #tpu.memory_space<vmem>>) attributes {dimension_semantics = [#tpu.dimension_semantics<parallel>], iteration_bounds = array<i64: 1>, scalar_prefetch = 0 : i64, scratch_operands = 0 : i64, tpu.core_type = #tpu.core_type<tc>, window_params = [{transform_indices = @transform_0, window_bounds = array<i64: 256, 32>}, {pipeline_mode = #tpu.pipeline_mode<synchronous>, transform_indices = @transform_1, window_bounds = array<i64: 32, 128>}, {pipeline_mode = #tpu.pipeline_mode<synchronous>, transform_indices = @transform_2, window_bounds = array<i64: 1, 128>}, {pipeline_mode = #tpu.pipeline_mode<synchronous>, transform_indices = @transform_3, window_bounds = array<i64: 128, 128>}, {pipeline_mode = #tpu.pipeline_mode<synchronous>, transform_indices = @transform_4, window_bounds = array<i64: 1, 128>}, {pipeline_mode = #tpu.pipeline_mode<synchronous>, transform_indices = @transform_5, window_bounds = array<i64: 128, 128>}, {pipeline_mode = #tpu.pipeline_mode<synchronous>, transform_indices = @transform_6, window_bounds = array<i64: 1, 128>}, {transform_indices = @transform_7, window_bounds = array<i64: 256, 128>}]} {
    %c0 = arith.constant 0 : index
    %c0_0 = arith.constant 0 : index
    %0 = vector.load %arg1[%c0, %c0_0] : memref<256x32xf32, #tpu.memory_space<vmem>>, vector<256x32xf32>
    %c0_1 = arith.constant 0 : index
    %c0_2 = arith.constant 0 : index
    %1 = vector.load %arg2[%c0_1, %c0_2] : memref<32x128xf32, #tpu.memory_space<vmem>>, vector<32x128xf32>
    %cst = arith.constant dense<0.000000e+00> : vector<256x128xf32>
    %2 = tpu.matmul %0, %1, %cst {dimension_numbers = #tpu.dot_dimension_numbers<[1], [0], [0], [1], [0, 0, 1, 1], [], []>} : vector<256x32xf32>, vector<32x128xf32>, vector<256x128xf32> -> vector<256x128xf32>
    %c0_3 = arith.constant 0 : index
    %c0_4 = arith.constant 0 : index
    %3 = vector.load %arg3[%c0_3, %c0_4] : memref<1x128xf32, #tpu.memory_space<vmem>>, vector<1x128xf32>
    %4 = vector.broadcast %3 : vector<1x128xf32> to vector<256x128xf32>
    %5 = arith.addf %2, %4 : vector<256x128xf32>
    %cst_5 = arith.constant 0.000000e+00 : f32
    %6 = vector.broadcast %cst_5 : f32 to vector<256x128xf32>
    %7 = arith.maximumf %5, %6 : vector<256x128xf32>
    %c0_6 = arith.constant 0 : index
    %c0_7 = arith.constant 0 : index
    %8 = vector.load %arg4[%c0_6, %c0_7] : memref<128x128xf32, #tpu.memory_space<vmem>>, vector<128x128xf32>
    %cst_8 = arith.constant dense<0.000000e+00> : vector<256x128xf32>
    %9 = tpu.matmul %7, %8, %cst_8 {dimension_numbers = #tpu.dot_dimension_numbers<[1], [0], [0], [1], [0, 0, 1, 1], [], []>} : vector<256x128xf32>, vector<128x128xf32>, vector<256x128xf32> -> vector<256x128xf32>
    %c0_9 = arith.constant 0 : index
    %c0_10 = arith.constant 0 : index
    %10 = vector.load %arg5[%c0_9, %c0_10] : memref<1x128xf32, #tpu.memory_space<vmem>>, vector<1x128xf32>
    %11 = vector.broadcast %10 : vector<1x128xf32> to vector<256x128xf32>
    %12 = arith.addf %9, %11 : vector<256x128xf32>
    %cst_11 = arith.constant 0.000000e+00 : f32
    %13 = vector.broadcast %cst_11 : f32 to vector<256x128xf32>
    %14 = arith.maximumf %12, %13 : vector<256x128xf32>
    %c0_12 = arith.constant 0 : index
    %c0_13 = arith.constant 0 : index
    %15 = vector.load %arg6[%c0_12, %c0_13] : memref<128x128xf32, #tpu.memory_space<vmem>>, vector<128x128xf32>
    %cst_14 = arith.constant dense<0.000000e+00> : vector<256x128xf32>
    %16 = tpu.matmul %14, %15, %cst_14 {dimension_numbers = #tpu.dot_dimension_numbers<[1], [0], [0], [1], [0, 0, 1, 1], [], []>} : vector<256x128xf32>, vector<128x128xf32>, vector<256x128xf32> -> vector<256x128xf32>
    %c0_15 = arith.constant 0 : index
    %c0_16 = arith.constant 0 : index
    %17 = vector.load %arg7[%c0_15, %c0_16] : memref<1x128xf32, #tpu.memory_space<vmem>>, vector<1x128xf32>
    %18 = vector.broadcast %17 : vector<1x128xf32> to vector<256x128xf32>
    %19 = arith.addf %16, %18 : vector<256x128xf32>
    %c0_17 = arith.constant 0 : index
    %c0_18 = arith.constant 0 : index
    %20 = vector.load %arg8[%c0_17, %c0_18] : memref<256x128xf32, #tpu.memory_space<vmem>>, vector<256x128xf32>
    tpu.vector_store %arg8[%c0_17, %c0_18], %19 {strides = array<i32>} : memref<256x128xf32, #tpu.memory_space<vmem>>, vector<256x128xf32>,
    return
  }
  func.func @transform_0(%arg0: i32) -> (i32, i32) {
    %c0_i32 = arith.constant 0 : i32
    %c0_i32_0 = arith.constant 0 : i32
    return %arg0, %c0_i32 : i32, i32
  }
  func.func @transform_1(%arg0: i32) -> (i32, i32) {
    %c0_i32 = arith.constant 0 : i32
    %c0_i32_0 = arith.constant 0 : i32
    %c0_i32_1 = arith.constant 0 : i32
    return %c0_i32, %c0_i32_0 : i32, i32
  }
  func.func @transform_2(%arg0: i32) -> (i32, i32) {
    %c0_i32 = arith.constant 0 : i32
    %c0_i32_0 = arith.constant 0 : i32
    %c0_i32_1 = arith.constant 0 : i32
    return %c0_i32, %c0_i32_0 : i32, i32
  }
  func.func @transform_3(%arg0: i32) -> (i32, i32) {
    %c0_i32 = arith.constant 0 : i32
    %c0_i32_0 = arith.constant 0 : i32
    %c0_i32_1 = arith.constant 0 : i32
    return %c0_i32, %c0_i32_0 : i32, i32
  }
  func.func @transform_4(%arg0: i32) -> (i32, i32) {
    %c0_i32 = arith.constant 0 : i32
    %c0_i32_0 = arith.constant 0 : i32
    %c0_i32_1 = arith.constant 0 : i32
    return %c0_i32, %c0_i32_0 : i32, i32
  }
  func.func @transform_5(%arg0: i32) -> (i32, i32) {
    %c0_i32 = arith.constant 0 : i32
    %c0_i32_0 = arith.constant 0 : i32
    %c0_i32_1 = arith.constant 0 : i32
    return %c0_i32, %c0_i32_0 : i32, i32
  }
  func.func @transform_6(%arg0: i32) -> (i32, i32) {
    %c0_i32 = arith.constant 0 : i32
    %c0_i32_0 = arith.constant 0 : i32
    %c0_i32_1 = arith.constant 0 : i32
    return %c0_i32, %c0_i32_0 : i32, i32
  }
  func.func @transform_7(%arg0: i32) -> (i32, i32) {
    %c0_i32 = arith.constant 0 : i32
    %c0_i32_0 = arith.constant 0 : i32
    return %arg0, %c0_i32 : i32, i32
  }
}

</mosaic_0001>

<bundles_post_ra>
// kernel: tpu_custom_call.1
= control target key start
LH: loop header
LB: loop body
LE: loop exit
PB: predicated region body
PF: predicated region fallthrough
CT: control target
= control target key end

     0   :  { %vm70_vm0 = vcmask 261120   ;;  %s1915_s0 = inlined_call_operand.vmem [shape: f32[256,32], index: 0, kind: input, shape index: {}]   ;;  %s1916_s1 = inlined_call_operand.vmem [shape: f32[32,128], index: 1, kind: input, shape index: {}]   ;;  %s1917_s2 = inlined_call_operand.vmem [shape: f32[1,128], index: 2, kind: input, shape index: {}]   ;;  %s1918_s3 = inlined_call_operand.vmem [shape: f32[128,128], index: 3, kind: input, shape index: {}]   ;;  %s1919_s4 = inlined_call_operand.vmem [shape: f32[1,128], index: 4, kind: input, shape index: {}]   ;;  %s1920_s5 = inlined_call_operand.vmem [shape: f32[128,128], index: 5, kind: input, shape index: {}]   ;;  %s1921_s6 = inlined_call_operand.vmem [shape: f32[1,128], index: 6, kind: input, shape index: {}]   ;;  %s1922_s7 = inlined_call_operand.hbm [shape: f32[256,128], index: 7, kind: output, shape index: {}]  }
   0x1   :  { %v59_v0 = vld [vmem:[%s1916_s1] sm:$0xff]  ;;  %v60_v1 = vld [vmem:[%s1916_s1 + $0x8] sm:$0xff]  ;;  %v61_v2 = vld [vmem:[%s1916_s1 + $0x10] sm:$0xff] }
   0x2   :  { %v1383_v3 = vpack.c.bf16 %v60_v1, %v59_v0  ;;  %v62_v4 = vld [vmem:[%s1916_s1 + $0x18] sm:$0xff]  ;;  %v27_v5 = vld [vmem:[%s1915_s0] sm:$0xff]  ;;  %v28_v8 = vld [vmem:[%s1915_s0 + $0x8] sm:$0xff] }
   0x3   :  { %v1387_v6 = vpack.c.bf16 %v62_v4, %v61_v2  ;;  %1175 = vmatprep.mubr.msk.f32.mxu0 %vm70_vm0, %v27_v5  ;;  %v43_v7 = vld [vmem:[%s1915_s0 + $0x80] sm:$0xff]  ;;  %v44_v9 = vld [vmem:[%s1915_s0 + $0x88] sm:$0xff]  ;;  %v29_v10 = vld [vmem:[%s1915_s0 + $0x10] sm:$0xff] }
   0x4   :  { %1384 = vmatprep.subr.bf16.mxu0 %v1383_v3  ;;  %1455 = vmatprep.subr.bf16.mxu1 %v1383_v3  ;;  %v45_v11 = vld [vmem:[%s1915_s0 + $0x90] sm:$0xff]  ;;  %v30_v12 = vld [vmem:[%s1915_s0 + $0x18] sm:$0xff]  ;;  %v424_v14 = vld [vmem:[%s1918_s3] sm:$0xff] }
   0x5   :  { %1386 = vmatpush3.bf16.msra.mxu0 %v1383_v3  ;;  %1457 = vmatpush3.bf16.msra.mxu1 %v1383_v3  ;;  %v46_v13 = vld [vmem:[%s1915_s0 + $0x98] sm:$0xff]  ;;  %v425_v15 = vld [vmem:[%s1918_s3 + $0x8] sm:$0xff]  ;;  %v31_v16 = vld [vmem:[%s1915_s0 + $0x20] sm:$0xff] }
   0x6   :  { %1388 = vmatprep.subr.bf16.mxu0 %v1387_v6  ;;  %1456 = vmatprep.subr.bf16.mxu1 %v1387_v6  ;;  %v47_v17 = vld [vmem:[%s1915_s0 + $0xa0] sm:$0xff]  ;;  %v1391_v18 = vpack.c.bf16 %v425_v15, %v424_v14  ;;  %v426_v19 = vld [vmem:[%s1918_s3 + $0x10] sm:$0xff]  ;;  %v427_v20 = vld [vmem:[%s1918_s3 + $0x18] sm:$0xff] }
   0x7   :  { %1199 = vmatprep.mubr.msk.f32.mxu1 %vm70_vm0, %v43_v7  ;;  %v32_v21 = vld [vmem:[%s1915_s0 + $0x28] sm:$0xff] }
   0x8   :  { %v48_v22 = vld [vmem:[%s1915_s0 + $0xa8] sm:$0xff] }
   0x9   :  { %1390 = vmatpush3.bf16.msra.mxu0 %v1387_v6  ;;  %1458 = vmatpush3.bf16.msra.mxu1 %v1387_v6 }
   0xc   :  { %1176 = vmatmul.mubr.msk.f32.vlgmr.msra.gmra.mrb[0].mxu0 %vm70_vm0, %v28_v8  ;;  %1200 = vmatmul.mubr.msk.f32.vlgmr.msra.gmra.mrb[0].mxu1 %vm70_vm0, %v44_v9 }
   0xd   :  { %1178 = vmatprep.mubr.msk.f32.mxu0 %vm70_vm0, %v29_v10  ;;  %1202 = vmatprep.mubr.msk.f32.mxu1 %vm70_vm0, %v45_v11 }
  0x10   :  { %1179 = vmatmul.mubr.msk.f32.gmra.mrb[2].mxu0 %vm70_vm0, %v30_v12  ;;  %1203 = vmatmul.mubr.msk.f32.gmra.mrb[2].mxu1 %vm70_vm0, %v46_v13 }
  0x11   :  { %1181 = vmatprep.mubr.msk.f32.mxu0 %vm70_vm0, %v31_v16  ;;  %1205 = vmatprep.mubr.msk.f32.mxu1 %vm70_vm0, %v47_v17 }
  0x12   :  { %12 = vsyncpa [#allocation3], 0  ;;  %v33_v23 = vld [vmem:[%s1915_s0 + $0x30] sm:$0xff]  ;;  %1392 = vmatprep.subr.bf16.mxu1 %v1391_v18  ;;  %v1395_v25 = vpack.c.bf16 %v427_v20, %v426_v19  ;;  %v428_v26 = vld [vmem:[%s1918_s3 + $0x20] sm:$0xff] }
  0x13   :  { %v49_v24 = vld [vmem:[%s1915_s0 + $0xb0] sm:$0xff]  ;;  %1394 = vmatpush3.bf16.msra.mxu1 %v1391_v18  ;;  %v429_v27 = vld [vmem:[%s1918_s3 + $0x28] sm:$0xff]  ;;  %v34_v28 = vld [vmem:[%s1915_s0 + $0x38] sm:$0xff] }
  0x14   :  { %1182 = vmatmul.mubr.msk.f32.gmra.mrb[4].mxu0 %vm70_vm0, %v32_v21  ;;  %1206 = vmatmul.mubr.msk.f32.gmra.mrb[4].mxu1 %vm70_vm0, %v48_v22  ;;  %v50_v29 = vld [vmem:[%s1915_s0 + $0xb8] sm:$0xff]  ;;  %v35_v30 = vld [vmem:[%s1915_s0 + $0x40] sm:$0xff]  ;;  %v1399_v32 = vpack.c.bf16 %v429_v27, %v428_v26  ;;  %v430_v33 = vld [vmem:[%s1918_s3 + $0x30] sm:$0xff] }
  0x15   :  { %1184 = vmatprep.mubr.msk.f32.mxu0 %vm70_vm0, %v33_v23  ;;  %1208 = vmatprep.mubr.msk.f32.mxu1 %vm70_vm0, %v49_v24  ;;  %v51_v31 = vld [vmem:[%s1915_s0 + $0xc0] sm:$0xff]  ;;  %v431_v34 = vld [vmem:[%s1918_s3 + $0x38] sm:$0xff]  ;;  %v36_v35 = vld [vmem:[%s1915_s0 + $0x48] sm:$0xff] }
  0x16   :  { %1396 = vmatprep.subr.bf16.mxu1 %v1395_v25  ;;  %v52_v36 = vld [vmem:[%s1915_s0 + $0xc8] sm:$0xff]  ;;  %v37_v37 = vld [vmem:[%s1915_s0 + $0x50] sm:$0xff]  ;;  %v1403_v39 = vpack.c.bf16 %v431_v34, %v430_v33  ;;  %v432_v40 = vld [vmem:[%s1918_s3 + $0x40] sm:$0xff] }
  0x17   :  { %1398 = vmatpush3.bf16.msra.mxu1 %v1395_v25  ;;  %v53_v38 = vld [vmem:[%s1915_s0 + $0xd0] sm:$0xff]  ;;  %v433_v41 = vld [vmem:[%s1918_s3 + $0x48] sm:$0xff]  ;;  %v38_v42 = vld [vmem:[%s1915_s0 + $0x58] sm:$0xff] }
  0x18   :  { %1185 = vmatmul.mubr.msk.f32.gmra.mrb[6].mxu0 %vm70_vm0, %v34_v28  ;;  %1209 = vmatmul.mubr.msk.f32.gmra.mrb[6].mxu1 %vm70_vm0, %v50_v29  ;;  %v54_v43 = vld [vmem:[%s1915_s0 + $0xd8] sm:$0xff]  ;;  %v39_v44 = vld [vmem:[%s1915_s0 + $0x60] sm:$0xff]  ;;  %v1407_v46 = vpack.c.bf16 %v433_v41, %v432_v40  ;;  %v434_v47 = vld [vmem:[%s1918_s3 + $0x50] sm:$0xff] }
  0x19   :  { %1187 = vmatprep.mubr.msk.f32.mxu0 %vm70_vm0, %v35_v30  ;;  %1211 = vmatprep.mubr.msk.f32.mxu1 %vm70_vm0, %v51_v31  ;;  %v55_v45 = vld [vmem:[%s1915_s0 + $0xe0] sm:$0xff]  ;;  %v435_v48 = vld [vmem:[%s1918_s3 + $0x58] sm:$0xff]  ;;  %v40_v49 = vld [vmem:[%s1915_s0 + $0x68] sm:$0xff] }
  0x1a   :  { %1400 = vmatprep.subr.bf16.mxu1 %v1399_v32  ;;  %v41_v50 = vld [vmem:[%s1915_s0 + $0x70] sm:$0xff]  ;;  %v56_v51 = vld [vmem:[%s1915_s0 + $0xe8] sm:$0xff]  ;;  %v1411_v53 = vpack.c.bf16 %v435_v48, %v434_v47  ;;  %v436_v54 = vld [vmem:[%s1918_s3 + $0x60] sm:$0xff] }
  0x1b   :  { %1402 = vmatpush3.bf16.msra.mxu1 %v1399_v32  ;;  %v57_v52 = vld [vmem:[%s1915_s0 + $0xf0] sm:$0xff]  ;;  %v437_v55 = vld [vmem:[%s1918_s3 + $0x68] sm:$0xff]  ;;  %v42_v56 = vld [vmem:[%s1915_s0 + $0x78] sm:$0xff] }
  0x1c   :  { %1188 = vmatmul.mubr.msk.f32.gmra.mrb[8].mxu0 %vm70_vm0, %v36_v35  ;;  %1212 = vmatmul.mubr.msk.f32.gmra.mrb[8].mxu1 %vm70_vm0, %v52_v36  ;;  %v58_v57 = vld [vmem:[%s1915_s0 + $0xf8] sm:$0xff]  ;;  %v1415_v58 = vpack.c.bf16 %v437_v55, %v436_v54  ;;  %v438_v59 = vld [vmem:[%s1918_s3 + $0x70] sm:$0xff]  ;;  %v704_v62 = vld [vmem:[%s1920_s5] sm:$0xff] }
  0x1d   :  { %1190 = vmatprep.mubr.msk.f32.mxu0 %vm70_vm0, %v37_v37  ;;  %1214 = vmatprep.mubr.msk.f32.mxu1 %vm70_vm0, %v53_v38  ;;  %v439_v60 = vld [vmem:[%s1918_s3 + $0x78] sm:$0xff]  ;;  %v705_v63 = vld [vmem:[%s1920_s5 + $0x8] sm:$0xff]  ;;  %v706_v0 = vld [vmem:[%s1920_s5 + $0x10] sm:$0xff] }
  0x1e   :  { %1404 = vmatprep.subr.bf16.mxu1 %v1403_v39  ;;  %v1419_v61 = vpack.c.bf16 %v439_v60, %v438_v59  ;;  %v1423_v1 = vpack.c.bf16 %v705_v63, %v704_v62  ;;  %v707_v2 = vld [vmem:[%s1920_s5 + $0x18] sm:$0xff]  ;;  %v708_v4 = vld [vmem:[%s1920_s5 + $0x20] sm:$0xff]  ;;  %v709_v5 = vld [vmem:[%s1920_s5 + $0x28] sm:$0xff] }
  0x1f   :  { %1406 = vmatpush3.bf16.msra.mxu1 %v1403_v39  ;;  %v1427_v3 = vpack.c.bf16 %v707_v2, %v706_v0  ;;  %v1431_v6 = vpack.c.bf16 %v709_v5, %v708_v4  ;;  %v710_v7 = vld [vmem:[%s1920_s5 + $0x30] sm:$0xff]  ;;  %v711_v8 = vld [vmem:[%s1920_s5 + $0x38] sm:$0xff]  ;;  %v712_v10 = vld [vmem:[%s1920_s5 + $0x40] sm:$0xff] }
  0x20   :  { %1191 = vmatmul.mubr.msk.f32.gmra.mrb[10].mxu0 %vm70_vm0, %v38_v42  ;;  %1215 = vmatmul.mubr.msk.f32.gmra.mrb[10].mxu1 %vm70_vm0, %v54_v43  ;;  %v1435_v9 = vpack.c.bf16 %v711_v8, %v710_v7  ;;  %v713_v11 = vld [vmem:[%s1920_s5 + $0x48] sm:$0xff]  ;;  %v714_v13 = vld [vmem:[%s1920_s5 + $0x50] sm:$0xff]  ;;  %v715_v14 = vld [vmem:[%s1920_s5 + $0x58] sm:$0xff] }
  0x21   :  { %1193 = vmatprep.mubr.msk.f32.mxu0 %vm70_vm0, %v39_v44  ;;  %1217 = vmatprep.mubr.msk.f32.mxu1 %vm70_vm0, %v55_v45  ;;  %v1439_v12 = vpack.c.bf16 %v713_v11, %v712_v10  ;;  %v1443_v15 = vpack.c.bf16 %v715_v14, %v714_v13  ;;  %v716_v16 = vld [vmem:[%s1920_s5 + $0x60] sm:$0xff]  ;;  %v717_v17 = vld [vmem:[%s1920_s5 + $0x68] sm:$0xff] }
  0x22   :  { %1408 = vmatprep.subr.bf16.mxu1 %v1407_v46  ;;  %1424 = vmatprep.subr.bf16.mxu0 %v1423_v1  ;;  %v1447_v18 = vpack.c.bf16 %v717_v17, %v716_v16  ;;  %v1762_v19 = vld [vmem:[%s1917_s2] ss:$0 sm:$0xff] }
  0x23   :  { %1410 = vmatpush3.bf16.msra.mxu1 %v1407_v46  ;;  %1426 = vmatpush3.bf16.msra.mxu0 %v1423_v1 }
  0x24   :  { %1194 = vmatmul.mubr.msk.f32.gmra.mrb[12].mxu0 %vm70_vm0, %v40_v49  ;;  %1218 = vmatmul.mubr.msk.f32.gmra.mrb[12].mxu1 %vm70_vm0, %v56_v51 }
  0x25   :  { %1196 = vmatprep.mubr.msk.f32.mxu0 %vm70_vm0, %v41_v50  ;;  %1220 = vmatprep.mubr.msk.f32.mxu1 %vm70_vm0, %v57_v52 }
  0x26   :  { %1412 = vmatprep.subr.bf16.mxu1 %v1411_v53  ;;  %1428 = vmatprep.subr.bf16.mxu0 %v1427_v3 }
  0x27   :  { %1414 = vmatpush3.bf16.msra.mxu1 %v1411_v53  ;;  %1430 = vmatpush3.bf16.msra.mxu0 %v1427_v3 }
  0x28   :  { %1197 = vmatmul.mubr.msk.f32.gmra.mrb[14].mxu0 %vm70_vm0, %v42_v56  ;;  %1221 = vmatmul.mubr.msk.f32.gmra.mrb[14].mxu1 %vm70_vm0, %v58_v57 }
  0x29   :  { %1416 = vmatprep.subr.bf16.mxu1 %v1415_v58  ;;  %1432 = vmatprep.subr.bf16.mxu0 %v1431_v6 }
  0x2b   :  { %1418 = vmatpush3.bf16.msra.mxu1 %v1415_v58  ;;  %1434 = vmatpush3.bf16.msra.mxu0 %v1431_v6 }
  0x2c   :  { %1420 = vmatprep.subr.bf16.mxu1 %v1419_v61  ;;  %1436 = vmatprep.subr.bf16.mxu0 %v1435_v9 }
  0x2f   :  { %1422 = vmatpush3.bf16.msra.mxu1 %v1419_v61  ;;  %1438 = vmatpush3.bf16.msra.mxu0 %v1435_v9 }
  0x30   :  { %1440 = vmatprep.subr.bf16.mxu0 %v1439_v12 }
  0x33   :  { %1442 = vmatpush3.bf16.msra.mxu0 %v1439_v12 }
  0x34   :  { %1444 = vmatprep.subr.bf16.mxu0 %v1443_v15 }
  0x37   :  { %1446 = vmatpush3.bf16.msra.mxu0 %v1443_v15 }
  0x38   :  { %1448 = vmatprep.subr.bf16.mxu0 %v1447_v18 }
  0x3b   :  { %1450 = vmatpush3.bf16.msra.mxu0 %v1447_v18 }
  0xdf   :  { %v1177_v20 = vpop.f32.mrb[0].mxu0  ;;  %v1764_v21 = vpop.f32.mrb[0].mxu1 }
  0xe0   :  { %v239_v22 = vadd.f32 %v1177_v20, %v1762_v19  ;;  %v233_v23 = vpop.f32.mrb[1].mxu0  ;;  %v1767_v24 = vpop.f32.mrb[1].mxu1 }
  0xe1   :  { %v234_v25 = vadd.f32 %v1762_v19, %v233_v23  ;;  %v314_v12 = vadd.f32 %v1762_v19, %v1767_v24 }
  0xe2   :  { %v393_v29 = vmax.f32 %v239_v22, 0.0 }
  0xe3   :  { %v392_v26 = vmax.f32 %v234_v25, 0.0  ;;  %v1180_v27 = vpop.f32.mrb[2].mxu0  ;;  %v1770_v28 = vpop.f32.mrb[2].mxu1  ;;  %v408_v22 = vmax.f32 %v314_v12, 0.0 }
  0xe4   :  { %v249_v30 = vadd.f32 %v1180_v27, %v1762_v19  ;;  %v243_v31 = vpop.f32.mrb[3].mxu0  ;;  %v1773_v32 = vpop.f32.mrb[3].mxu1 }
  0xe5   :  { %v244_v33 = vadd.f32 %v1762_v19, %v243_v31  ;;  %1255 = vmatprep.mubr.f32.mxu1 %v392_v26  ;;  %v324_v23 = vadd.f32 %v1762_v19, %v1773_v32  ;;  %v319_v26 = vadd.f32 %v1764_v21, %v1762_v19 }
  0xe6   :  { %1256 = vmatmul.mubr.f32.vlgmr.msra.gmra.mrb[16].mxu1 %v393_v29  ;;  %v395_v37 = vmax.f32 %v249_v30, 0.0  ;;  %v329_v30 = vadd.f32 %v1770_v28, %v1762_v19 }
  0xe7   :  { %v394_v34 = vmax.f32 %v244_v33, 0.0  ;;  %v1183_v35 = vpop.f32.mrb[4].mxu0  ;;  %v1776_v36 = vpop.f32.mrb[4].mxu1  ;;  %v410_v24 = vmax.f32 %v324_v23, 0.0  ;;  %v409_v29 = vmax.f32 %v319_v26, 0.0 }
  0xe8   :  { %v259_v38 = vadd.f32 %v1183_v35, %v1762_v19  ;;  %v253_v39 = vpop.f32.mrb[5].mxu0  ;;  %v1779_v40 = vpop.f32.mrb[5].mxu1  ;;  %v411_v33 = vmax.f32 %v329_v30, 0.0  ;;  %v339_v21 = vadd.f32 %v1776_v36, %v1762_v19 }
  0xe9   :  { %v254_v41 = vadd.f32 %v1762_v19, %v253_v39  ;;  %1258 = vmatprep.mubr.f32.mxu1 %v394_v34  ;;  %v334_v27 = vadd.f32 %v1762_v19, %v1779_v40 }
  0xea   :  { %1259 = vmatmul.mubr.f32.gmra.mrb[18].mxu1 %v395_v37  ;;  %v397_v45 = vmax.f32 %v259_v38, 0.0  ;;  %v413_v37 = vmax.f32 %v339_v21, 0.0 }
  0xeb   :  { %v396_v42 = vmax.f32 %v254_v41, 0.0  ;;  %v1186_v43 = vpop.f32.mrb[6].mxu0  ;;  %v1782_v44 = vpop.f32.mrb[6].mxu1  ;;  %v412_v31 = vmax.f32 %v334_v27, 0.0 }
  0xec   :  { %v269_v46 = vadd.f32 %v1186_v43, %v1762_v19  ;;  %v263_v47 = vpop.f32.mrb[7].mxu0  ;;  %v343_v48 = vpop.f32.mrb[7].mxu1  ;;  %v349_v38 = vadd.f32 %v1782_v44, %v1762_v19 }
  0xed   :  { %v264_v49 = vadd.f32 %v1762_v19, %v263_v47  ;;  %1261 = vmatprep.mubr.f32.mxu1 %v396_v42  ;;  %v344_v32 = vadd.f32 %v1762_v19, %v343_v48 }
  0xee   :  { %1262 = vmatmul.mubr.f32.gmra.mrb[20].mxu1 %v397_v45  ;;  %v399_v53 = vmax.f32 %v269_v46, 0.0  ;;  %v415_v40 = vmax.f32 %v349_v38, 0.0 }
  0xef   :  { %v398_v50 = vmax.f32 %v264_v49, 0.0  ;;  %v1189_v51 = vpop.f32.mrb[8].mxu0  ;;  %v1786_v52 = vpop.f32.mrb[8].mxu1  ;;  %v414_v34 = vmax.f32 %v344_v32, 0.0 }
  0xf0   :  { %v279_v54 = vadd.f32 %v1189_v51, %v1762_v19  ;;  %v273_v55 = vpop.f32.mrb[9].mxu0  ;;  %v353_v56 = vpop.f32.mrb[9].mxu1  ;;  %v359_v41 = vadd.f32 %v1786_v52, %v1762_v19 }
  0xf1   :  { %v274_v57 = vadd.f32 %v1762_v19, %v273_v55  ;;  %1264 = vmatprep.mubr.f32.mxu1 %v398_v50  ;;  %v354_v35 = vadd.f32 %v1762_v19, %v353_v56  ;;  %v1832_v56 = vld [vmem:[%s1919_s4] ss:$0 sm:$0xff] }
  0xf2   :  { %1265 = vmatmul.mubr.f32.gmra.mrb[22].mxu1 %v399_v53  ;;  %v401_v61 = vmax.f32 %v279_v54, 0.0  ;;  %v417_v43 = vmax.f32 %v359_v41, 0.0  ;;  %v718_v53 = vld [vmem:[%s1920_s5 + $0x70] sm:$0xff]  ;;  %v719_v54 = vld [vmem:[%s1920_s5 + $0x78] sm:$0xff] }
  0xf3   :  { %v400_v58 = vmax.f32 %v274_v57, 0.0  ;;  %v1192_v59 = vpop.f32.mrb[10].mxu0  ;;  %v1790_v60 = vpop.f32.mrb[10].mxu1  ;;  %v416_v28 = vmax.f32 %v354_v35, 0.0  ;;  %v1451_v55 = vpack.c.bf16 %v719_v54, %v718_v53 }
  0xf4   :  { %v289_v62 = vadd.f32 %v1192_v59, %v1762_v19  ;;  %v283_v63 = vpop.f32.mrb[11].mxu0  ;;  %v363_v0 = vpop.f32.mrb[11].mxu1  ;;  %v369_v45 = vadd.f32 %v1790_v60, %v1762_v19 }
  0xf5   :  { %v284_v1 = vadd.f32 %v1762_v19, %v283_v63  ;;  %1267 = vmatprep.mubr.f32.mxu1 %v400_v58  ;;  %v364_v39 = vadd.f32 %v1762_v19, %v363_v0  ;;  %1452 = vmatprep.subr.bf16.mxu0 %v1451_v55 }
  0xf6   :  { %1268 = vmatmul.mubr.f32.gmra.mrb[24].mxu1 %v401_v61  ;;  %v403_v5 = vmax.f32 %v289_v62, 0.0  ;;  %v419_v47 = vmax.f32 %v369_v45, 0.0  ;;  %1454 = vmatpush3.bf16.msra.mxu0 %v1451_v55 }
  0xf7   :  { %v402_v2 = vmax.f32 %v284_v1, 0.0  ;;  %v1195_v3 = vpop.f32.mrb[12].mxu0  ;;  %v1219_v4 = vpop.f32.mrb[12].mxu1  ;;  %v418_v36 = vmax.f32 %v364_v39, 0.0 }
  0xf8   :  { %v299_v6 = vadd.f32 %v1195_v3, %v1762_v19  ;;  %v293_v7 = vpop.f32.mrb[13].mxu0  ;;  %v373_v8 = vpop.f32.mrb[13].mxu1  ;;  %v379_v48 = vadd.f32 %v1219_v4, %v1762_v19 }
  0xf9   :  { %v294_v9 = vadd.f32 %v1762_v19, %v293_v7  ;;  %1270 = vmatprep.mubr.f32.mxu1 %v402_v2  ;;  %v374_v42 = vadd.f32 %v1762_v19, %v373_v8 }
  0xfa   :  { %1271 = vmatmul.mubr.f32.gmra.mrb[26].mxu1 %v403_v5  ;;  %v405_v14 = vmax.f32 %v299_v6, 0.0  ;;  %v421_v50 = vmax.f32 %v379_v48, 0.0 }
  0xfb   :  { %v404_v10 = vmax.f32 %v294_v9, 0.0  ;;  %v1198_v11 = vpop.f32.mrb[14].mxu0  ;;  %v1222_v13 = vpop.f32.mrb[14].mxu1  ;;  %v420_v44 = vmax.f32 %v374_v42, 0.0 }
  0xfc   :  { %v309_v15 = vadd.f32 %v1198_v11, %v1762_v19  ;;  %v303_v16 = vpop.f32.mrb[15].mxu0  ;;  %v383_v17 = vpop.f32.mrb[15].mxu1  ;;  %v389_v51 = vadd.f32 %v1222_v13, %v1762_v19 }
  0xfd   :  { %v304_v18 = vadd.f32 %v1762_v19, %v303_v16  ;;  %1273 = vmatprep.mubr.f32.mxu1 %v404_v10  ;;  %v384_v46 = vadd.f32 %v1762_v19, %v383_v17 }
  0xfe   :  { %1274 = vmatmul.mubr.f32.gmra.mrb[28].mxu1 %v405_v14  ;;  %v407_v25 = vmax.f32 %v309_v15, 0.0  ;;  %v423_v52 = vmax.f32 %v389_v51, 0.0 }
  0xff   :  { %v406_v20 = vmax.f32 %v304_v18, 0.0  ;;  %v422_v49 = vmax.f32 %v384_v46, 0.0 }
 0x101   :  { %1276 = vmatprep.mubr.f32.mxu1 %v406_v20 }
 0x102   :  { %1277 = vmatmul.mubr.f32.gmra.mrb[30].mxu1 %v407_v25 }
 0x103   :  { %1279 = vmatprep.mubr.f32.mxu1 %v408_v22 }
 0x106   :  { %1280 = vmatmul.mubr.f32.gmra.mrb[32].mxu1 %v409_v29 }
 0x107   :  { %1282 = vmatprep.mubr.f32.mxu1 %v410_v24 }
 0x10a   :  { %1283 = vmatmul.mubr.f32.gmra.mrb[34].mxu1 %v411_v33 }
 0x10b   :  { %1285 = vmatprep.mubr.f32.mxu1 %v412_v31 }
 0x10e   :  { %1286 = vmatmul.mubr.f32.gmra.mrb[36].mxu1 %v413_v37 }
 0x10f   :  { %1288 = vmatprep.mubr.f32.mxu1 %v414_v34 }
 0x112   :  { %1289 = vmatmul.mubr.f32.gmra.mrb[38].mxu1 %v415_v40 }
 0x113   :  { %1291 = vmatprep.mubr.f32.mxu1 %v416_v28 }
 0x116   :  { %1292 = vmatmul.mubr.f32.gmra.mrb[40].mxu1 %v417_v43 }
 0x117   :  { %1294 = vmatprep.mubr.f32.mxu1 %v418_v36 }
 0x11a   :  { %1295 = vmatmul.mubr.f32.gmra.mrb[42].mxu1 %v419_v47 }
 0x11b   :  { %1297 = vmatprep.mubr.f32.mxu1 %v420_v44 }
 0x11e   :  { %1298 = vmatmul.mubr.f32.gmra.mrb[44].mxu1 %v421_v50 }
 0x11f   :  { %1300 = vmatprep.mubr.f32.mxu1 %v422_v49 }
 0x122   :  { %1301 = vmatmul.mubr.f32.gmra.mrb[46].mxu1 %v423_v52 }
 0x1b9   :  { %v1257_v19 = vpop.f32.mrb[16].mxu1 }
 0x1ba   :  { %v519_v57 = vadd.f32 %v1257_v19, %v1832_v56  ;;  %v513_v58 = vpop.f32.mrb[17].mxu1 }
 0x1bb   :  { %v514_v59 = vadd.f32 %v1832_v56, %v513_v58 }
 0x1bc   :  { %v673_v62 = vmax.f32 %v519_v57, 0.0 }
 0x1bd   :  { %v672_v60 = vmax.f32 %v514_v59, 0.0  ;;  %v1260_v61 = vpop.f32.mrb[18].mxu1 }
 0x1be   :  { %v529_v63 = vadd.f32 %v1260_v61, %v1832_v56  ;;  %v523_v0 = vpop.f32.mrb[19].mxu1 }
 0x1bf   :  { %v524_v1 = vadd.f32 %v1832_v56, %v523_v0  ;;  %1335 = vmatprep.mubr.f32.mxu0 %v672_v60 }
 0x1c0   :  { %1336 = vmatmul.mubr.f32.vlgmr.msra.gmra.mrb[16].mxu0 %v673_v62  ;;  %v675_v4 = vmax.f32 %v529_v63, 0.0 }
 0x1c1   :  { %v674_v2 = vmax.f32 %v524_v1, 0.0  ;;  %v1263_v3 = vpop.f32.mrb[20].mxu1 }
 0x1c2   :  { %v539_v5 = vadd.f32 %v1263_v3, %v1832_v56  ;;  %v533_v6 = vpop.f32.mrb[21].mxu1 }
 0x1c3   :  { %v534_v7 = vadd.f32 %v1832_v56, %v533_v6  ;;  %1338 = vmatprep.mubr.f32.mxu0 %v674_v2 }
 0x1c4   :  { %1339 = vmatmul.mubr.f32.gmra.mrb[18].mxu0 %v675_v4  ;;  %v677_v10 = vmax.f32 %v539_v5, 0.0 }
 0x1c5   :  { %v676_v8 = vmax.f32 %v534_v7, 0.0  ;;  %v1266_v9 = vpop.f32.mrb[22].mxu1 }
 0x1c6   :  { %v549_v11 = vadd.f32 %v1266_v9, %v1832_v56  ;;  %v543_v12 = vpop.f32.mrb[23].mxu1 }
 0x1c7   :  { %v544_v13 = vadd.f32 %v1832_v56, %v543_v12  ;;  %1341 = vmatprep.mubr.f32.mxu0 %v676_v8 }
 0x1c8   :  { %1342 = vmatmul.mubr.f32.gmra.mrb[20].mxu0 %v677_v10  ;;  %v679_v16 = vmax.f32 %v549_v11, 0.0 }
 0x1c9   :  { %v678_v14 = vmax.f32 %v544_v13, 0.0  ;;  %v1269_v15 = vpop.f32.mrb[24].mxu1 }
 0x1ca   :  { %v559_v17 = vadd.f32 %v1269_v15, %v1832_v56  ;;  %v553_v18 = vpop.f32.mrb[25].mxu1 }
 0x1cb   :  { %v554_v20 = vadd.f32 %v1832_v56, %v553_v18  ;;  %1344 = vmatprep.mubr.f32.mxu0 %v678_v14 }
 0x1cc   :  { %1345 = vmatmul.mubr.f32.gmra.mrb[22].mxu0 %v679_v16  ;;  %v681_v25 = vmax.f32 %v559_v17, 0.0 }
 0x1cd   :  { %v680_v22 = vmax.f32 %v554_v20, 0.0  ;;  %v1272_v23 = vpop.f32.mrb[26].mxu1 }
 0x1ce   :  { %v569_v26 = vadd.f32 %v1272_v23, %v1832_v56  ;;  %v563_v24 = vpop.f32.mrb[27].mxu1 }
 0x1cf   :  { %v564_v27 = vadd.f32 %v1832_v56, %v563_v24  ;;  %1347 = vmatprep.mubr.f32.mxu0 %v680_v22 }
 0x1d0   :  { %1348 = vmatmul.mubr.f32.gmra.mrb[24].mxu0 %v681_v25  ;;  %v683_v31 = vmax.f32 %v569_v26, 0.0 }
 0x1d1   :  { %v682_v29 = vmax.f32 %v564_v27, 0.0  ;;  %v1275_v30 = vpop.f32.mrb[28].mxu1  ;;  %v1869_v27 = vld [vmem:[%s1921_s6] ss:$0 sm:$0xff]  ;;  %s1486_s6 = smov [#allocation2]  }
 0x1d2   :  { %v579_v32 = vadd.f32 %v1275_v30, %v1832_v56  ;;  %v573_v33 = vpop.f32.mrb[29].mxu1  ;;  %s989_s15 = sshll.u32 %s1486_s6, 4  ;;  %s990_s15 = int_to_ptr.vmem [resolvable:$true] %s989_s15 }
 0x1d3   :  { %v574_v21 = vadd.f32 %v1832_v56, %v573_v33  ;;  %1350 = vmatprep.mubr.f32.mxu0 %v682_v29  ;;  %s1462_s16 = scalar_lea.vmem %s990_s15, 4096  ;;  %p1467_p1 = scmp.lt.s32.totalorder %s990_s15, %s990_s15 }
 0x1d4   :  { %1351 = vmatmul.mubr.f32.gmra.mrb[26].mxu0 %v683_v31  ;;  %v685_v37 = vmax.f32 %v579_v32, 0.0  ;;  %p1463_p0 = scmp.ne.s32.totalorder %s990_s15, %s1462_s16  ;;  %p1468_p2 = scmp.lt.s32.totalorder %s1462_s16, %s1462_s16 }
 0x1d5   :  { %v684_v34 = vmax.f32 %v574_v21, 0.0  ;;  %v1278_v35 = vpop.f32.mrb[30].mxu1 }
 0x1d6   :  { %v589_v38 = vadd.f32 %v1278_v35, %v1832_v56  ;;  %v583_v28 = vpop.f32.mrb[31].mxu1  ;;  %p1469_p3 = por %p1468_p2, %p1467_p1 }
 0x1d7   :  { %v584_v39 = vadd.f32 %v1832_v56, %v583_v28  ;;  %1353 = vmatprep.mubr.f32.mxu0 %v684_v34 }
 0x1d8   :  { %1354 = vmatmul.mubr.f32.gmra.mrb[28].mxu0 %v685_v37  ;;  %v687_v36 = vmax.f32 %v589_v38, 0.0  ;;  %p1470_p4 = pnand %p1469_p3, %p1463_p0 }
 0x1d9   :  { %v686_v40 = vmax.f32 %v584_v39, 0.0  ;;  %v1281_v41 = vpop.f32.mrb[32].mxu1 }
 0x1da   :  { %v599_v42 = vadd.f32 %v1281_v41, %v1832_v56  ;;  %v593_v43 = vpop.f32.mrb[33].mxu1 }
 0x1db   :  { %v594_v45 = vadd.f32 %v1832_v56, %v593_v43  ;;  %1356 = vmatprep.mubr.f32.mxu0 %v686_v40 }
 0x1dc   :  { %1357 = vmatmul.mubr.f32.gmra.mrb[30].mxu0 %v687_v36  ;;  %v689_v47 = vmax.f32 %v599_v42, 0.0 }
 0x1dd   :  { %v688_v44 = vmax.f32 %v594_v45, 0.0  ;;  %v1284_v46 = vpop.f32.mrb[34].mxu1 }
 0x1de   :  { %v609_v48 = vadd.f32 %v1284_v46, %v1832_v56  ;;  %v603_v49 = vpop.f32.mrb[35].mxu1 }
 0x1df   :  { %v604_v50 = vadd.f32 %v1832_v56, %v603_v49  ;;  %1359 = vmatprep.mubr.f32.mxu0 %v688_v44 }
 0x1e0   :  { %1360 = vmatmul.mubr.f32.gmra.mrb[32].mxu0 %v689_v47  ;;  %v691_v53 = vmax.f32 %v609_v48, 0.0 }
 0x1e1   :  { %v690_v51 = vmax.f32 %v604_v50, 0.0  ;;  %v1287_v52 = vpop.f32.mrb[36].mxu1 }
 0x1e2   :  { %v619_v54 = vadd.f32 %v1287_v52, %v1832_v56  ;;  %v613_v55 = vpop.f32.mrb[37].mxu1 }
 0x1e3   :  { %v614_v19 = vadd.f32 %v1832_v56, %v613_v55  ;;  %1362 = vmatprep.mubr.f32.mxu0 %v690_v51 }
 0x1e4   :  { %1363 = vmatmul.mubr.f32.gmra.mrb[34].mxu0 %v691_v53  ;;  %v693_v59 = vmax.f32 %v619_v54, 0.0 }
 0x1e5   :  { %v692_v57 = vmax.f32 %v614_v19, 0.0  ;;  %v1290_v58 = vpop.f32.mrb[38].mxu1 }
 0x1e6   :  { %v629_v60 = vadd.f32 %v1290_v58, %v1832_v56  ;;  %v623_v61 = vpop.f32.mrb[39].mxu1 }
 0x1e7   :  { %v624_v62 = vadd.f32 %v1832_v56, %v623_v61  ;;  %1365 = vmatprep.mubr.f32.mxu0 %v692_v57 }
 0x1e8   :  { %1366 = vmatmul.mubr.f32.gmra.mrb[36].mxu0 %v693_v59  ;;  %v695_v1 = vmax.f32 %v629_v60, 0.0 }
 0x1e9   :  { %v694_v63 = vmax.f32 %v624_v62, 0.0  ;;  %v1293_v0 = vpop.f32.mrb[40].mxu1 }
 0x1ea   :  { %v639_v2 = vadd.f32 %v1293_v0, %v1832_v56  ;;  %v633_v3 = vpop.f32.mrb[41].mxu1 }
 0x1eb   :  { %v634_v4 = vadd.f32 %v1832_v56, %v633_v3  ;;  %1368 = vmatprep.mubr.f32.mxu0 %v694_v63 }
 0x1ec   :  { %1369 = vmatmul.mubr.f32.gmra.mrb[38].mxu0 %v695_v1  ;;  %v697_v7 = vmax.f32 %v639_v2, 0.0 }
 0x1ed   :  { %v696_v5 = vmax.f32 %v634_v4, 0.0  ;;  %v1296_v6 = vpop.f32.mrb[42].mxu1 }
 0x1ee   :  { %v649_v8 = vadd.f32 %v1296_v6, %v1832_v56  ;;  %v643_v9 = vpop.f32.mrb[43].mxu1 }
 0x1ef   :  { %v644_v10 = vadd.f32 %v1832_v56, %v643_v9  ;;  %1371 = vmatprep.mubr.f32.mxu0 %v696_v5 }
 0x1f0   :  { %1372 = vmatmul.mubr.f32.gmra.mrb[40].mxu0 %v697_v7  ;;  %v699_v13 = vmax.f32 %v649_v8, 0.0 }
 0x1f1   :  { %v698_v11 = vmax.f32 %v644_v10, 0.0  ;;  %v1299_v12 = vpop.f32.mrb[44].mxu1 }
 0x1f2   :  { %v659_v14 = vadd.f32 %v1299_v12, %v1832_v56  ;;  %v653_v15 = vpop.f32.mrb[45].mxu1 }
 0x1f3   :  { %v654_v16 = vadd.f32 %v1832_v56, %v653_v15  ;;  %1374 = vmatprep.mubr.f32.mxu0 %v698_v11 }
 0x1f4   :  { %1375 = vmatmul.mubr.f32.gmra.mrb[42].mxu0 %v699_v13  ;;  %v701_v20 = vmax.f32 %v659_v14, 0.0 }
 0x1f5   :  { %v700_v17 = vmax.f32 %v654_v16, 0.0  ;;  %v1302_v18 = vpop.f32.mrb[46].mxu1 }
 0x1f6   :  { %v669_v22 = vadd.f32 %v1302_v18, %v1832_v56  ;;  %v663_v23 = vpop.f32.mrb[47].mxu1 }
 0x1f7   :  { %v664_v25 = vadd.f32 %v1832_v56, %v663_v23  ;;  %1377 = vmatprep.mubr.f32.mxu0 %v700_v17 }
 0x1f8   :  { %1378 = vmatmul.mubr.f32.gmra.mrb[44].mxu0 %v701_v20  ;;  %v703_v24 = vmax.f32 %v669_v22, 0.0 }
 0x1f9   :  { %v702_v26 = vmax.f32 %v664_v25, 0.0 }
 0x1fb   :  { %1380 = vmatprep.mubr.f32.mxu0 %v702_v26 }
 0x1fc   :  { %1381 = vmatmul.mubr.f32.gmra.mrb[46].mxu0 %v703_v24 }
 0x293   :  { %v1337_v29 = vpop.f32.mrb[16].mxu0 }
 0x294   :  { %v799_v30 = vadd.f32 %v1337_v29, %v1869_v27  ;;  %v793_v31 = vpop.f32.mrb[17].mxu0 }
 0x295   :  { %v794_v32 = vadd.f32 %v1869_v27, %v793_v31 }
 0x296   :  { %953 = vst [vmem:[#allocation2 + $0x8] sm:$0xff] %v799_v30 }
 0x297   :  { %952 = vst [vmem:[#allocation2] sm:$0xff] %v794_v32  ;;  %v1340_v56 = vpop.f32.mrb[18].mxu0 }
 0x298   :  { %v809_v33 = vadd.f32 %v1340_v56, %v1869_v27  ;;  %v803_v21 = vpop.f32.mrb[19].mxu0 }
 0x299   :  { %v804_v34 = vadd.f32 %v1869_v27, %v803_v21 }
 0x29a   :  { %955 = vst [vmem:[#allocation2 + $0x18] sm:$0xff] %v809_v33 }
 0x29b   :  { %954 = vst [vmem:[#allocation2 + $0x10] sm:$0xff] %v804_v34  ;;  %v1343_v35 = vpop.f32.mrb[20].mxu0 }
 0x29c   :  { %v819_v37 = vadd.f32 %v1343_v35, %v1869_v27  ;;  %v813_v38 = vpop.f32.mrb[21].mxu0 }
 0x29d   :  { %v814_v28 = vadd.f32 %v1869_v27, %v813_v38 }
 0x29e   :  { %957 = vst [vmem:[#allocation2 + $0x28] sm:$0xff] %v819_v37 }
 0x29f   :  { %956 = vst [vmem:[#allocation2 + $0x20] sm:$0xff] %v814_v28  ;;  %v1346_v39 = vpop.f32.mrb[22].mxu0 }
 0x2a0   :  { %v829_v40 = vadd.f32 %v1346_v39, %v1869_v27  ;;  %v823_v41 = vpop.f32.mrb[23].mxu0 }
 0x2a1   :  { %v824_v36 = vadd.f32 %v1869_v27, %v823_v41 }
 0x2a2   :  { %959 = vst [vmem:[#allocation2 + $0x38] sm:$0xff] %v829_v40 }
 0x2a3   :  { %958 = vst [vmem:[#allocation2 + $0x30] sm:$0xff] %v824_v36  ;;  %v1349_v42 = vpop.f32.mrb[24].mxu0 }
 0x2a4   :  { %v839_v43 = vadd.f32 %v1349_v42, %v1869_v27  ;;  %v833_v45 = vpop.f32.mrb[25].mxu0 }
 0x2a5   :  { %v834_v44 = vadd.f32 %v1869_v27, %v833_v45 }
 0x2a6   :  { %961 = vst [vmem:[#allocation2 + $0x48] sm:$0xff] %v839_v43 }
 0x2a7   :  { %960 = vst [vmem:[#allocation2 + $0x40] sm:$0xff] %v834_v44  ;;  %v1352_v46 = vpop.f32.mrb[26].mxu0 }
 0x2a8   :  { %v849_v47 = vadd.f32 %v1352_v46, %v1869_v27  ;;  %v843_v48 = vpop.f32.mrb[27].mxu0 }
 0x2a9   :  { %v844_v49 = vadd.f32 %v1869_v27, %v843_v48 }
 0x2aa   :  { %963 = vst [vmem:[#allocation2 + $0x58] sm:$0xff] %v849_v47 }
 0x2ab   :  { %962 = vst [vmem:[#allocation2 + $0x50] sm:$0xff] %v844_v49  ;;  %v1355_v50 = vpop.f32.mrb[28].mxu0 }
 0x2ac   :  { %v859_v51 = vadd.f32 %v1355_v50, %v1869_v27  ;;  %v853_v52 = vpop.f32.mrb[29].mxu0 }
 0x2ad   :  { %v854_v53 = vadd.f32 %v1869_v27, %v853_v52 }
 0x2ae   :  { %965 = vst [vmem:[#allocation2 + $0x68] sm:$0xff] %v859_v51 }
 0x2af   :  { %964 = vst [vmem:[#allocation2 + $0x60] sm:$0xff] %v854_v53  ;;  %v1358_v54 = vpop.f32.mrb[30].mxu0 }
 0x2b0   :  { %v869_v55 = vadd.f32 %v1358_v54, %v1869_v27  ;;  %v863_v19 = vpop.f32.mrb[31].mxu0 }
 0x2b1   :  { %v864_v57 = vadd.f32 %v1869_v27, %v863_v19 }
 0x2b2   :  { %967 = vst [vmem:[#allocation2 + $0x78] sm:$0xff] %v869_v55 }
 0x2b3   :  { %966 = vst [vmem:[#allocation2 + $0x70] sm:$0xff] %v864_v57  ;;  %v1361_v58 = vpop.f32.mrb[32].mxu0 }
 0x2b4   :  { %v879_v59 = vadd.f32 %v1361_v58, %v1869_v27  ;;  %v873_v60 = vpop.f32.mrb[33].mxu0 }
 0x2b5   :  { %v874_v61 = vadd.f32 %v1869_v27, %v873_v60 }
 0x2b6   :  { %969 = vst [vmem:[#allocation2 + $0x88] sm:$0xff] %v879_v59 }
 0x2b7   :  { %968 = vst [vmem:[#allocation2 + $0x80] sm:$0xff] %v874_v61  ;;  %v1364_v62 = vpop.f32.mrb[34].mxu0 }
 0x2b8   :  { %v889_v63 = vadd.f32 %v1364_v62, %v1869_v27  ;;  %v883_v0 = vpop.f32.mrb[35].mxu0 }
 0x2b9   :  { %v884_v1 = vadd.f32 %v1869_v27, %v883_v0 }
 0x2ba   :  { %971 = vst [vmem:[#allocation2 + $0x98] sm:$0xff] %v889_v63 }
 0x2bb   :  { %970 = vst [vmem:[#allocation2 + $0x90] sm:$0xff] %v884_v1  ;;  %v1367_v2 = vpop.f32.mrb[36].mxu0 }
 0x2bc   :  { %v899_v3 = vadd.f32 %v1367_v2, %v1869_v27  ;;  %v893_v4 = vpop.f32.mrb[37].mxu0 }
 0x2bd   :  { %v894_v5 = vadd.f32 %v1869_v27, %v893_v4 }
 0x2be   :  { %973 = vst [vmem:[#allocation2 + $0xa8] sm:$0xff] %v899_v3 }
 0x2bf   :  { %972 = vst [vmem:[#allocation2 + $0xa0] sm:$0xff] %v894_v5  ;;  %v1370_v6 = vpop.f32.mrb[38].mxu0 }
 0x2c0   :  { %v909_v7 = vadd.f32 %v1370_v6, %v1869_v27  ;;  %v903_v8 = vpop.f32.mrb[39].mxu0 }
 0x2c1   :  { %v904_v9 = vadd.f32 %v1869_v27, %v903_v8 }
 0x2c2   :  { %975 = vst [vmem:[#allocation2 + $0xb8] sm:$0xff] %v909_v7 }
 0x2c3   :  { %974 = vst [vmem:[#allocation2 + $0xb0] sm:$0xff] %v904_v9  ;;  %v1373_v10 = vpop.f32.mrb[40].mxu0 }
 0x2c4   :  { %v919_v11 = vadd.f32 %v1373_v10, %v1869_v27  ;;  %v913_v12 = vpop.f32.mrb[41].mxu0 }
 0x2c5   :  { %v914_v13 = vadd.f32 %v1869_v27, %v913_v12 }
 0x2c6   :  { %977 = vst [vmem:[#allocation2 + $0xc8] sm:$0xff] %v919_v11 }
 0x2c7   :  { %976 = vst [vmem:[#allocation2 + $0xc0] sm:$0xff] %v914_v13  ;;  %v1376_v14 = vpop.f32.mrb[42].mxu0 }
 0x2c8   :  { %v929_v15 = vadd.f32 %v1376_v14, %v1869_v27  ;;  %v923_v16 = vpop.f32.mrb[43].mxu0 }
 0x2c9   :  { %v924_v17 = vadd.f32 %v1869_v27, %v923_v16 }
 0x2ca   :  { %979 = vst [vmem:[#allocation2 + $0xd8] sm:$0xff] %v929_v15 }
 0x2cb   :  { %978 = vst [vmem:[#allocation2 + $0xd0] sm:$0xff] %v924_v17  ;;  %v1379_v18 = vpop.f32.mrb[44].mxu0 }
 0x2cc   :  { %v939_v20 = vadd.f32 %v1379_v18, %v1869_v27  ;;  %v933_v22 = vpop.f32.mrb[45].mxu0 }
 0x2cd   :  { %v934_v23 = vadd.f32 %v1869_v27, %v933_v22 }
 0x2ce   :  { %981 = vst [vmem:[#allocation2 + $0xe8] sm:$0xff] %v939_v20 }
 0x2cf   :  { %980 = vst [vmem:[#allocation2 + $0xe0] sm:$0xff] %v934_v23  ;;  %v1382_v25 = vpop.f32.mrb[46].mxu0 }
 0x2d0   :  { %v949_v26 = vadd.f32 %v1382_v25, %v1869_v27  ;;  %v943_v24 = vpop.f32.mrb[47].mxu0 }
 0x2d1   :  { %v944_v29 = vadd.f32 %v1869_v27, %v943_v24 }
 0x2d2   :  { %983 = vst [vmem:[#allocation2 + $0xf8] sm:$0xff] %v949_v26 }
 0x2d3   :  { %982 = vst [vmem:[#allocation2 + $0xf0] sm:$0xff] %v944_v29 }
 0x2d4   :  { %1473 = shalt.err (!%p1470_p4)
}
 0x2d5   :  { %s1474_s19 = scalar_lea.hbm %s1922_s7, 4096 }
 0x2d6   :  { %p1475_p5 = scmp.ne.s32.totalorder %s1922_s7, %s1474_s19  ;;  %p1478_p6 = scmp.lt.u32.totalorder %s1474_s19, %s1922_s7 }
 0x2d8   :  { %p1480_p7 = pnand %p1478_p6, %p1475_p5 }
 0x2da   :  { %1483 = shalt.err (!%p1480_p7)
}
 0x2db   :  { %s1487_s24 = smov 128   ;;  %s1488_s25 = smov 8  }
 0x2dc   :  { %995 = dma.vmem_to_hbm [thread:$0]  %s990_s15, 4096, %s1922_s7, [#allocation3], %s1487_s24, %s1487_s24, %s1488_s25  }
 0x2dd   :  { %1484 = dma.done.wait [#allocation3], 4096  }
 0x2de   :  { %1485 = vsyncadd [#allocation3], 4294963200 }
 0x2df   :  { %999 = vsyncpa [#allocation3], 1 }

</bundles_post_ra>
